<compile_context>
chip_gen: v7x
topology: tpu7x:2x2x1
jax: 0.10.0
libtpu: 0.0.40
codegen_flags: <defaults>
</compile_context>

<pallas_src>
import math

import jax
import jax.numpy as jnp
import numpy as np
from jax.experimental import pallas as pl
from jax.experimental.pallas import tpu as pltpu

D_MODEL = 1
N_HEAD = 1
D_HEAD = D_MODEL // N_HEAD   # 1
D_ALL = N_HEAD * D_HEAD      # 1

LANE = 128
SUBLANE = 8
MAX_BLOCK_ROWS = 2048        # 2048x128 f32 = 1 MiB tile; (in+out) x 2 bufs = 4 MiB


def _round_up(a, b):
    return ((a + b - 1) // b) * b


def _scale_kernel(scale_ref, x_ref, o_ref):
    """out = x * scale for one lane-dense (block_rows, 128) tile.

    `scale` is the folded (wv * wfc) 1x1 weight in SMEM.  One vld + one vmul
    + one vst per tile -> purely HBM-bandwidth bound."""
    o_ref[...] = x_ref[...] * scale_ref[0, 0]


def _run_slab_kernel(x_slab, scale):
    """Stream a (rows, 128) slab through the scale kernel."""
    rows = x_slab.shape[0]
    if rows <= SUBLANE:
        block_rows = rows                                   # full-dim block (legal)
    else:
        # >=2 grid steps (helps v7x 2-TC sharding), capped at a 1 MiB tile.
        block_rows = min(MAX_BLOCK_ROWS,
                         _round_up(pl.cdiv(rows, 2), SUBLANE))
    grid = (pl.cdiv(rows, block_rows),)                     # ragged last block OK

    return pl.pallas_call(
        _scale_kernel,
        out_shape=jax.ShapeDtypeStruct((rows, LANE), x_slab.dtype),
        grid=grid,
        in_specs=[
            pl.BlockSpec(memory_space=pltpu.MemorySpace.SMEM),    # scale (1,1)
            pl.BlockSpec((block_rows, LANE), lambda i: (i, 0)),   # x slab
        ],
        out_specs=pl.BlockSpec((block_rows, LANE), lambda i: (i, 0)),
        compiler_params=pltpu.CompilerParams(
            dimension_semantics=("parallel",)),
        cost_estimate=pl.CostEstimate(
            flops=rows * LANE,
            transcendentals=0,
            bytes_accessed=2 * rows * LANE * x_slab.dtype.itemsize),
    )(scale, x_slab)


def mha_model_forward(x, mask, wq, wk, wv, wfc):
    """Reproduces Model.forward's returned value (`attn`, eval mode).

    `mask`, `wq`, `wk` are accepted for signature parity with the PyTorch
    module but are mathematically unused for d_model == n_head == 1 (softmax
    over a singleton axis cancels q and k; mask is never read)."""
    del mask, wq, wk
    nq, dm = x.shape
    assert dm == D_MODEL and nq >= 1

    # Fold the two 1x1 weights into a single SMEM scalar (keep the multiply
    # inside the kernel; do not pre-scale x in the wrapper).
    scale = (wv * wfc).reshape(1, 1)

    n = nq * D_MODEL
    x_flat = x.reshape(-1)
    n_bulk = (n // LANE) * LANE
    n_tail = n - n_bulk

    pieces = []
    if n_bulk:
        if n_tail:
            x_slab = x_flat[:n_bulk].reshape(n_bulk // LANE, LANE)
        else:
            x_slab = x_flat.reshape(n // LANE, LANE)        # zero-copy reshape
        pieces.append(_run_slab_kernel(x_slab, scale).reshape(-1))
    if n_tail:
        # <128-element tail: tiny jnp epilogue instead of padding + slicing
        # the whole array through HBM.
        pieces.append(x_flat[n_bulk:] * scale[0, 0])

    out_flat = pieces[0] if len(pieces) == 1 else jnp.concatenate(pieces)
    return out_flat.reshape(nq, D_ALL)


def _xavier_uniform(key, shape):
    fan_in, fan_out = shape[1], shape[0]
    bound = math.sqrt(6.0 / (fan_in + fan_out))
    return jax.random.uniform(key, shape, jnp.float32, -bound, bound)


def _reference(x, wq, wk, wv, wfc):
    """Pure-JAX reference of the same (eval-mode) forward pass, written in the
    UNFOLDED form (q/k projections, explicit size-1 softmax) to check that the
    folded kernel preserves the original module semantics."""
    q = x * wq[0, 0]
    k = x * wk[0, 0]
    v = x * wv[0, 0]
    a = (q * k) / math.sqrt(D_HEAD)
    p = jnp.exp(a - a)                  # softmax over a singleton axis
    b = p / p
    c = b * v
    d = D_HEAD * c
    return d * wfc[0, 0]


if __name__ == "__main__":
    key = jax.random.PRNGKey(0)
    k_q, k_k, k_v, k_fc, k_x = jax.random.split(key, 5)

    # deterministic xavier_uniform init, matching the module's (1,1) weights
    wq = _xavier_uniform(k_q, (D_MODEL, D_MODEL))
    wk = _xavier_uniform(k_k, (D_MODEL, D_MODEL))
    wv = _xavier_uniform(k_v, (D_MODEL, D_MODEL))
    wfc = _xavier_uniform(k_fc, (N_HEAD, N_HEAD))

    # nq=8    -> tail-only (jnp epilogue) path
    # nq=256  -> aligned, single-block Pallas kernel path
    # nq=300  -> aligned bulk via kernel + 44-element jnp tail
    # nq=4224 -> aligned, multi-step grid with a ragged last block
    for nq in (8, 256, 300, 4224):
        k_x, sub = jax.random.split(k_x)
        x = jax.random.normal(sub, (nq, D_MODEL), jnp.float32)
        mask = None   # never read by the reference forward

        out = jax.block_until_ready(mha_model_forward(x, mask, wq, wk, wv, wfc))
        ref = _reference(x, wq, wk, wv, wfc)
        np.testing.assert_allclose(np.asarray(out), np.asarray(ref),
                                   rtol=1e-6, atol=1e-6)

    print("KERNEL_OK")
</pallas_src>

<mosaic_0001>
module attributes {stable_mosaic.version = 11 : i64} {
  func.func @_scale_kernel(%arg0: i32, %arg1: memref<1x1xf32, #tpu.memory_space<smem>>, %arg2: memref<2x128xf32, #tpu.memory_space<vmem>>, %arg3: memref<2x128xf32, #tpu.memory_space<vmem>>) attributes {dimension_semantics = [#tpu.dimension_semantics<parallel>], iteration_bounds = array<i64: 1>, scalar_prefetch = 0 : i64, scratch_operands = 0 : i64, tpu.core_type = #tpu.core_type<tc>, window_params = [{transform_indices = @transform_0, window_bounds = array<i64: 1, 1>}, {transform_indices = @transform_1, window_bounds = array<i64: 2, 128>}, {transform_indices = @transform_2, window_bounds = array<i64: 2, 128>}]} {
    %c0 = arith.constant 0 : index
    %c0_0 = arith.constant 0 : index
    %0 = vector.load %arg2[%c0, %c0_0] : memref<2x128xf32, #tpu.memory_space<vmem>>, vector<2x128xf32>
    %c0_1 = arith.constant 0 : index
    %c0_2 = arith.constant 0 : index
    %1 = memref.load %arg1[%c0_1, %c0_2] : memref<1x1xf32, #tpu.memory_space<smem>>
    %2 = vector.broadcast %1 : f32 to vector<2x128xf32>
    %3 = arith.mulf %0, %2 : vector<2x128xf32>
    %c0_3 = arith.constant 0 : index
    %c0_4 = arith.constant 0 : index
    %4 = vector.load %arg3[%c0_3, %c0_4] : memref<2x128xf32, #tpu.memory_space<vmem>>, vector<2x128xf32>
    tpu.vector_store %arg3[%c0_3, %c0_4], %3 {strides = array<i32>} : memref<2x128xf32, #tpu.memory_space<vmem>>, vector<2x128xf32>,
    return
  }
  func.func @transform_0(%arg0: i32) -> (i32, i32) {
    %c0_i32 = arith.constant 0 : i32
    %c0_i32_0 = arith.constant 0 : i32
    %c0_i32_1 = arith.constant 0 : i32
    return %c0_i32, %c0_i32_0 : i32, i32
  }
  func.func @transform_1(%arg0: i32) -> (i32, i32) {
    %c0_i32 = arith.constant 0 : i32
    %c0_i32_0 = arith.constant 0 : i32
    return %arg0, %c0_i32 : i32, i32
  }
  func.func @transform_2(%arg0: i32) -> (i32, i32) {
    %c0_i32 = arith.constant 0 : i32
    %c0_i32_0 = arith.constant 0 : i32
    return %arg0, %c0_i32 : i32, i32
  }
}

</mosaic_0001>

<bundles_post_ra>
// kernel: tpu_custom_call.1
= control target key start
LH: loop header
LB: loop body
LE: loop exit
PB: predicated region body
PF: predicated region fallthrough
CT: control target
= control target key end

     0   :  { %s91_s0 = inlined_call_operand.<no memory space> [shape: f32[1,1], index: 0, kind: input, shape index: {}]   ;;  %s92_s1 = inlined_call_operand.vmem [shape: f32[2,128], index: 1, kind: input, shape index: {}]   ;;  %s93_s2 = inlined_call_operand.hbm [shape: f32[2,128], index: 2, kind: output, shape index: {}]  }
   0x1   :  { %v13_v0 = vld [vmem:[%s92_s1] sm:$0x3]  ;;  %v15_v1 = vstv %s91_s0 }
   0x2   :  { %8 = vsyncpa [#allocation4], 0  ;;  %v16_v2 = vmul.f32 %v15_v1, %v13_v0  ;;  %s57_s13 = smov [#allocation3]  }
   0x3   :  { %s24_s14 = sshll.u32 %s57_s13, 4  ;;  %s25_s14 = int_to_ptr.vmem [resolvable:$true] %s24_s14 }
   0x4   :  { %17 = vst [vmem:[#allocation3] sm:$0x3] %v16_v2  ;;  %s33_s15 = scalar_lea.vmem %s25_s14, 32  ;;  %p38_p1 = scmp.lt.s32.totalorder %s25_s14, %s25_s14 }
   0x5   :  { %p34_p0 = scmp.ne.s32.totalorder %s25_s14, %s33_s15  ;;  %p39_p2 = scmp.lt.s32.totalorder %s33_s15, %s33_s15 }
   0x7   :  { %p40_p3 = por %p39_p2, %p38_p1 }
   0x9   :  { %p41_p4 = pnand %p40_p3, %p34_p0 }
   0xb   :  { %44 = shalt.err (!%p41_p4)
}
   0xc   :  { %s45_s1 = scalar_lea.hbm %s93_s2, 32 }
   0xd   :  { %p46_p5 = scmp.ne.s32.totalorder %s93_s2, %s45_s1  ;;  %p49_p6 = scmp.lt.u32.totalorder %s45_s1, %s93_s2 }
   0xf   :  { %p51_p7 = pnand %p49_p6, %p46_p5 }
  0x11   :  { %54 = shalt.err (!%p51_p7)
}
  0x12   :  { %27 = dma.vmem_to_hbm [thread:$0]  %s25_s14, 32, %s93_s2, [#allocation4]  }
  0x13   :  { %55 = dma.done.wait [#allocation4], 32  }
  0x14   :  { %56 = vsyncadd [#allocation4], 4294967264 }
  0x15   :  { %31 = vsyncpa [#allocation4], 1 }

</bundles_post_ra>
